<compile_context>
chip_gen: v6e
topology: v6e:2x2x1
jax: 0.10.0
libtpu: 0.0.40
codegen_flags: <defaults>
</compile_context>

<pallas_src>
import functools

import numpy as np
import jax
import jax.numpy as jnp
from jax.experimental import pallas as pl
from jax.experimental.pallas import tpu as pltpu


def _smooth_dielectric_kernel(x_ref, out_ref):
    # x_ref: (8, TN) lane-dense input slab.
    #   row 0: light, row 1: distance, rows 2-4: diffuse_albedo,
    #   rows 5-7: specular_albedo.
    # out_ref: (6, TN) lane-dense output slab.
    #   rows 0-2: diffuse_rgb, rows 3-5: specular_rgb.
    x = x_ref[...]                                      # (8, TN)
    light = x[0:1, :]                                   # (1, TN)
    dist = x[1:2, :]                                    # (1, TN)
    diff_albedo = x[2:5, :]                             # (3, TN)
    spec_albedo = x[5:8, :]                             # (3, TN)

    light_intensity = light / (dist * dist + 1e-10)     # (1, TN)

    # Fold the scalar constants into the (1, TN) factor before the sublane
    # broadcast so the (3, TN) work is a single multiply each.
    out_ref[0:3, :] = (light_intensity * 1e-4) * diff_albedo   # diffuse
    out_ref[3:6, :] = (light_intensity * 0.04) * spec_albedo   # specular


def _smooth_dielectric_render_impl(light, distance, diffuse_albedo,
                                   specular_albedo, tile_n):
    lead = light.shape[:-1]
    N = int(np.prod(lead)) if lead else 1

    def flat(x, c):
        return jnp.asarray(x, jnp.float32).reshape(N, c)

    l2 = flat(light, 1)
    d2 = flat(distance, 1)
    da = flat(diffuse_albedo, 3)
    sa = flat(specular_albedo, 3)

    # Lane alignment / tiling: pad the point count to a multiple of the tile.
    n128 = ((N + 127) // 128) * 128
    tile = min(tile_n, n128)
    n_pad = ((n128 + tile - 1) // tile) * tile

    def pack_rows(x):
        # (N, C) row-major -> (C, n_pad) lane-dense, zero padded along points.
        # Zero padding is safe: light=0, dist=0 -> 0/(0+1e-10)=0 (no NaN/Inf).
        xp = jnp.pad(x, ((0, n_pad - N), (0, 0)))
        return xp.T

    packed = jnp.concatenate(
        [pack_rows(l2), pack_rows(d2), pack_rows(da), pack_rows(sa)], axis=0)
    # packed: (8, n_pad)

    grid = (n_pad // tile,)

    # VMEM budget: double-buffered (8, tile) input + (6, tile) output that
    # sublane-pads to 8 rows.  Clamp to stay well under v7x's 64 MiB.
    block_bytes = (8 + 8) * tile * 4
    vmem_limit = int(min(max(2 * block_bytes + (8 << 20), 32 << 20), 56 << 20))

    cost = pl.CostEstimate(
        flops=6 * n_pad,
        transcendentals=0,
        bytes_accessed=(8 + 6) * n_pad * 4,
    )

    out6 = pl.pallas_call(
        _smooth_dielectric_kernel,
        out_shape=jax.ShapeDtypeStruct((6, n_pad), jnp.float32),
        grid_spec=pl.GridSpec(
            grid=grid,
            in_specs=[pl.BlockSpec((8, tile), lambda i: (0, i))],
            out_specs=pl.BlockSpec((6, tile), lambda i: (0, i)),
        ),
        compiler_params=pltpu.CompilerParams(
            dimension_semantics=("parallel",),
            vmem_limit_bytes=vmem_limit,
        ),
        cost_estimate=cost,
    )(packed)

    # Unpack (fused with the pallas_call under jit): slice valid points,
    # transpose back to [..., 3], and compute rgb here (saves 1/3 of the
    # kernel's write bandwidth).
    diffuse = out6[0:3, :N].T.reshape(*lead, 3)
    specular = out6[3:6, :N].T.reshape(*lead, 3)
    rgb = diffuse + specular

    return {"diffuse_rgb": diffuse, "specular_rgb": specular, "rgb": rgb}


_jitted_impl = jax.jit(_smooth_dielectric_render_impl,
                       static_argnames=("tile_n",))


def smooth_dielectric_render(light, distance, normal, viewdir,
                             diffuse_albedo, specular_albedo, alpha,
                             tile_n=131072):
    """Inputs are [..., C] (C=1 for light/distance/alpha, C=3 otherwise).

    normal / viewdir / alpha do not influence the module's outputs (the dot
    product and eta constants in the PyTorch forward are dead code), so they
    are not shipped to the kernel at all.
    """
    del normal, viewdir, alpha  # unused by the forward's outputs
    return _jitted_impl(light, distance, diffuse_albedo, specular_albedo,
                        tile_n=int(tile_n))


# -------------------- pure-JAX reference (for verification) --------------------
def _reference(light, distance, normal, viewdir, diffuse_albedo,
               specular_albedo, alpha):
    del normal, viewdir, alpha
    light_intensity = light / (distance * distance + 1e-10)
    specular_rgb = light_intensity * specular_albedo * 0.04
    diffuse_rgb = light_intensity * diffuse_albedo * 0.0001
    return diffuse_rgb, specular_rgb, diffuse_rgb + specular_rgb


if __name__ == "__main__":
    key = jax.random.PRNGKey(0)
    ks = jax.random.split(key, 8)
    B, R = 2, 128                      # small: batch 2 x 128 rays
    shape = (B, R)

    light = jax.random.uniform(ks[0], shape + (1,), jnp.float32, 5.0, 20.0)
    distance = jax.random.uniform(ks[1], shape + (1,), jnp.float32, 1.0, 4.0)
    normal = jax.random.normal(ks[2], shape + (3,), jnp.float32)
    normal = normal / jnp.linalg.norm(normal, axis=-1, keepdims=True)
    viewdir = jax.random.normal(ks[3], shape + (3,), jnp.float32)
    viewdir = viewdir / jnp.linalg.norm(viewdir, axis=-1, keepdims=True)
    diffuse_albedo = jax.random.uniform(ks[4], shape + (3,), jnp.float32, 0.0, 1.0)
    specular_albedo = jax.random.uniform(ks[5], shape + (3,), jnp.float32, 0.0, 1.0)
    alpha = jax.random.uniform(ks[6], shape + (1,), jnp.float32, 0.01, 0.8)

    out = smooth_dielectric_render(light, distance, normal, viewdir,
                                   diffuse_albedo, specular_albedo, alpha)
    jax.block_until_ready(out["rgb"])

    ref_d, ref_s, ref_rgb = _reference(light, distance, normal, viewdir,
                                       diffuse_albedo, specular_albedo, alpha)
    np.testing.assert_allclose(np.asarray(out["diffuse_rgb"]), np.asarray(ref_d),
                               rtol=1e-4, atol=1e-6)
    np.testing.assert_allclose(np.asarray(out["specular_rgb"]), np.asarray(ref_s),
                               rtol=1e-4, atol=1e-6)
    np.testing.assert_allclose(np.asarray(out["rgb"]), np.asarray(ref_rgb),
                               rtol=1e-4, atol=1e-6)

    print("KERNEL_OK")
</pallas_src>

<mosaic_0001>
module attributes {stable_mosaic.version = 11 : i64} {
  func.func @_smooth_dielectric_kernel(%arg0: i32, %arg1: memref<8x256xf32, #tpu.memory_space<vmem>>, %arg2: memref<6x256xf32, #tpu.memory_space<vmem>>) attributes {dimension_semantics = [#tpu.dimension_semantics<parallel>], iteration_bounds = array<i64: 1>, scalar_prefetch = 0 : i64, scratch_operands = 0 : i64, tpu.core_type = #tpu.core_type<tc>, window_params = [{transform_indices = @transform_0, window_bounds = array<i64: 8, 256>}, {transform_indices = @transform_1, window_bounds = array<i64: 6, 256>}]} {
    %c0 = arith.constant 0 : index
    %c0_0 = arith.constant 0 : index
    %0 = vector.load %arg1[%c0, %c0_0] : memref<8x256xf32, #tpu.memory_space<vmem>>, vector<8x256xf32>
    %1 = vector.extract_strided_slice %0 {offsets = [0, 0], sizes = [1, 256], strides = [1, 1]} : vector<8x256xf32> to vector<1x256xf32>
    %2 = vector.extract_strided_slice %0 {offsets = [1, 0], sizes = [1, 256], strides = [1, 1]} : vector<8x256xf32> to vector<1x256xf32>
    %3 = vector.extract_strided_slice %0 {offsets = [2, 0], sizes = [3, 256], strides = [1, 1]} : vector<8x256xf32> to vector<3x256xf32>
    %4 = vector.extract_strided_slice %0 {offsets = [5, 0], sizes = [3, 256], strides = [1, 1]} : vector<8x256xf32> to vector<3x256xf32>
    %5 = arith.mulf %2, %2 : vector<1x256xf32>
    %cst = arith.constant 1.000000e-10 : f32
    %6 = vector.broadcast %cst : f32 to vector<1x256xf32>
    %7 = arith.addf %5, %6 : vector<1x256xf32>
    %8 = arith.divf %1, %7 : vector<1x256xf32>
    %cst_1 = arith.constant 9.99999974E-5 : f32
    %9 = vector.broadcast %cst_1 : f32 to vector<1x256xf32>
    %10 = arith.mulf %8, %9 : vector<1x256xf32>
    %11 = vector.broadcast %10 : vector<1x256xf32> to vector<3x256xf32>
    %12 = arith.mulf %11, %3 : vector<3x256xf32>
    %c0_2 = arith.constant 0 : index
    %c0_3 = arith.constant 0 : index
    %13 = vector.load %arg2[%c0_2, %c0_3] : memref<6x256xf32, #tpu.memory_space<vmem>>, vector<3x256xf32>
    tpu.vector_store %arg2[%c0_2, %c0_3], %12 {strides = array<i32>} : memref<6x256xf32, #tpu.memory_space<vmem>>, vector<3x256xf32>,
    %cst_4 = arith.constant 4.000000e-02 : f32
    %14 = vector.broadcast %cst_4 : f32 to vector<1x256xf32>
    %15 = arith.mulf %8, %14 : vector<1x256xf32>
    %16 = vector.broadcast %15 : vector<1x256xf32> to vector<3x256xf32>
    %17 = arith.mulf %16, %4 : vector<3x256xf32>
    %c3 = arith.constant 3 : index
    %c0_5 = arith.constant 0 : index
    %18 = vector.load %arg2[%c3, %c0_5] : memref<6x256xf32, #tpu.memory_space<vmem>>, vector<3x256xf32>
    tpu.vector_store %arg2[%c3, %c0_5], %17 {strides = array<i32>} : memref<6x256xf32, #tpu.memory_space<vmem>>, vector<3x256xf32>,
    return
  }
  func.func @transform_0(%arg0: i32) -> (i32, i32) {
    %c0_i32 = arith.constant 0 : i32
    %c0_i32_0 = arith.constant 0 : i32
    return %c0_i32, %arg0 : i32, i32
  }
  func.func @transform_1(%arg0: i32) -> (i32, i32) {
    %c0_i32 = arith.constant 0 : i32
    %c0_i32_0 = arith.constant 0 : i32
    return %c0_i32, %arg0 : i32, i32
  }
}

</mosaic_0001>

<bundles_post_ra>
// kernel: _smooth_dielectric_render_impl.1
= control target key start
LH: loop header
LB: loop body
LE: loop exit
PB: predicated region body
PF: predicated region fallthrough
CT: control target
= control target key end

     0   :  { %v26_v8 = vlaneseq  ;;  %s100_s0 = inlined_call_operand.vmem [shape: f32[8,256], index: 0, kind: input, shape index: {}]   ;;  %s101_s1 = inlined_call_operand.vmem [shape: f32[6,256], index: 1, kind: output, shape index: {}]  }
   0x1   :  { %v8_v0 = vld [vmem:[%s100_s0] sm:$0xff]  ;;  %v9_v1 = vld [vmem:[%s100_s0 + $0x8] sm:$0xff] }
   0x2   :  { %v10_v2 = vmul.f32 %v8_v0, %v8_v0  ;;  %v11_v3 = vmul.f32 %v9_v1, %v9_v1  ;;  %v27_v9 = vshrl.u32 %v26_v8, 7 }
   0x4   :  { %v12_v4 = vadd.f32 1e-10, %v10_v2  ;;  %v13_v5 = vadd.f32 1e-10, %v11_v3  ;;  %v28_v13 = vsub.s32 0, %v27_v9 }
   0x6   :  { %v16_v6 = vrot.slane %v12_v4, 1  ;;  %v17_v7 = vrot.slane %v13_v5, 1 }
   0x8   :  { %68 = vrcp.f32 %v16_v6 }
   0x9   :  { %70 = vrcp.f32 %v17_v7 }
  0x15   :  { %v69_v10 = vpop.eup %68 }
  0x16   :  { %v71_v11 = vpop.eup %70  ;;  %v21_v12 = vmul.f32 %v69_v10, %v8_v0 }
  0x17   :  { %v23_v14 = vmul.f32 %v71_v11, %v9_v1 }
  0x18   :  { %v24_v15 = vmul.f32 0.0001, %v21_v12  ;;  %v44_v16 = vmul.f32 0.04, %v21_v12 }
  0x19   :  { %v25_v17 = vmul.f32 0.0001, %v23_v14  ;;  %v45_v18 = vmul.f32 0.04, %v23_v14 }
  0x1a   :  { %v29_v19 = vrot.slane %v24_v15, %v28_v13  ;;  %v49_v20 = vrot.slane %v44_v16, %v28_v13 }
  0x1b   :  { %v33_v21 = vrot.slane %v25_v17, %v28_v13  ;;  %v53_v22 = vrot.slane %v45_v18, %v28_v13 }
  0x1c   :  { %v34_v23 = vmul.f32 %v29_v19, %v8_v0  ;;  %v54_v24 = vmul.f32 %v49_v20, %v8_v0 }
  0x1d   :  { %v35_v25 = vmul.f32 %v33_v21, %v9_v1  ;;  %v55_v26 = vmul.f32 %v53_v22, %v9_v1 }
  0x1e   :  { %v38_v27 = vrot.slane %v34_v23, 2  ;;  %v58_v28 = vrot.slane %v54_v24, 2 }
  0x1f   :  { %v39_v29 = vrot.slane %v35_v25, 2  ;;  %v59_v30 = vrot.slane %v55_v26, 2 }
  0x20   :  { %42 = vst [vmem:[%s101_s1] sm:$0x7] %v38_v27  ;;  %62 = vst [vmem:[%s101_s1] sm:$0x38] %v58_v28 }
  0x21   :  { %43 = vst [vmem:[%s101_s1 + $0x8] sm:$0x7] %v39_v29  ;;  %63 = vst [vmem:[%s101_s1 + $0x8] sm:$0x38] %v59_v30 }

</bundles_post_ra>
